<compile_context>
chip_gen: v7x
topology: tpu7x:2x2x1
jax: 0.10.0
libtpu: 0.0.40
codegen_flags: <defaults>
</compile_context>

<pallas_src>
import jax
import jax.numpy as jnp
from jax import lax
from jax.experimental import pallas as pl
from jax.experimental.pallas import tpu as pltpu

# ---- small synthetic Llama config -------------------------------------------------
B = 2            # batch
S = 8            # sequence length
T = B * S        # flattened tokens
HIDDEN = 32      # hidden size
NH = 4           # attention heads (no GQA)
HD = HIDDEN // NH
INTER = 64       # MLP intermediate size
VOCAB = 128      # vocab size
EPS = 1e-6
ROPE_THETA = 10000.0
NEG = -1e9       # additive mask value

# lane offsets inside the f32 constant slab (T, CONST_W)
_COS = 0                      # cos, tiled per head          (T, 32)
_SSL = 1 * HIDDEN             # -sin on low half, 0 on high  (T, 32)
_SSR = 2 * HIDDEN             # +sin on high half, 0 on low  (T, 32)
_LN1 = 3 * HIDDEN             # input_layernorm weight, broadcast over T
_LN2 = 4 * HIDDEN             # post_attention_layernorm weight, broadcast over T
_MSK = 5 * HIDDEN             # block-diagonal additive mask (T, T)
CONST_W = 5 * HIDDEN + T      # 176

# lane offsets inside the bf16 weight slab (HIDDEN, WSLAB_W)
_WQKV = 0                     # fused q|k|v projection (scale folded into q)  (32, 96)
_WO = 3 * HIDDEN              # output projection                             (32, 32)
_WGU = 4 * HIDDEN             # fused gate|up projection                      (32, 128)
WSLAB_W = 4 * HIDDEN + 2 * INTER  # 256


# ---- the fused decoder-layer kernel (single shot, no grid) --------------------------
def decoder_layer_kernel(ids_ref, emb_ref, const_ref, w_ref, wd_ref, out_ref):
    f32 = jnp.float32
    bf16 = jnp.bfloat16

    # static slices of the packed constant / weight slabs (free)
    cos = const_ref[:, _COS:_COS + HIDDEN]        # (T, H)
    ssl = const_ref[:, _SSL:_SSL + HIDDEN]        # (T, H)
    ssr = const_ref[:, _SSR:_SSR + HIDDEN]        # (T, H)
    ln1 = const_ref[:, _LN1:_LN1 + HIDDEN]        # (T, H)
    ln2 = const_ref[:, _LN2:_LN2 + HIDDEN]        # (T, H)
    mask = const_ref[:, _MSK:_MSK + T]            # (T, T)

    wqkv = w_ref[:, _WQKV:_WQKV + 3 * HIDDEN]     # (H, 3H) bf16
    wo = w_ref[:, _WO:_WO + HIDDEN]               # (H, H)  bf16
    wgu = w_ref[:, _WGU:_WGU + 2 * INTER]         # (H, 2I) bf16

    # ---- embedding: one-hot built in-register (gather via MXU) ----
    ids = ids_ref[...]                                                     # (T, 1) int32
    onehot = (ids == lax.broadcasted_iota(jnp.int32, (T, VOCAB), 1)).astype(f32)
    x = jnp.dot(onehot, emb_ref[...], preferred_element_type=f32)          # (T, H) f32

    def rmsnorm(t, w):
        var = jnp.mean(t * t, axis=-1, keepdims=True)
        return t * lax.rsqrt(var + EPS) * w

    # ---- self attention ----
    xn = rmsnorm(x, ln1)                                                   # (T, H) f32
    qkv = jnp.dot(xn.astype(bf16), wqkv, preferred_element_type=f32)       # (T, 3H) one MXU push
    q = qkv[:, :HIDDEN]
    k = qkv[:, HIDDEN:2 * HIDDEN]
    v = qkv[:, 2 * HIDDEN:]

    def rope_flat(t):
        # rotate_half per 8-lane head group, done in the flat (T, NH*HD) layout:
        # "left"  = t shifted left by HD/2 lanes (valid for the low half of each head)
        # "right" = t shifted right by HD/2 lanes (valid for the high half of each head)
        # sign and half-selection are folded into the precomputed ssl / ssr operands.
        left = jnp.concatenate([t[:, HD // 2:], t[:, :HD // 2]], axis=-1)
        right = jnp.concatenate([t[:, -(HD // 2):], t[:, :-(HD // 2)]], axis=-1)
        return t * cos + left * ssl + right * ssr

    qr = rope_flat(q)                                                      # scale already in wq
    kr = rope_flat(k)

    def split_heads(t):  # (T, H) -> (NH, T, HD) via static lane slices (no reshape)
        return jnp.stack([t[:, n * HD:(n + 1) * HD] for n in range(NH)], axis=0)

    qh = split_heads(qr).astype(bf16)                                      # (NH, T, HD)
    kh = split_heads(kr).astype(bf16)
    vh = split_heads(v).astype(bf16)

    s = jnp.einsum('nqd,nkd->nqk', qh, kh, preferred_element_type=f32) + mask[None]  # (NH,T,T)
    m = jnp.max(s, axis=-1, keepdims=True)
    p = jnp.exp(s - m)
    l = jnp.sum(p, axis=-1, keepdims=True)
    p = p * pl.reciprocal(l, approx=True)                                  # softmax, f32

    o = jnp.einsum('nqk,nkd->nqd', p.astype(bf16), vh, preferred_element_type=f32)   # (NH,T,HD)
    o_flat = jnp.concatenate([o[n] for n in range(NH)], axis=-1)           # (T, H) heads -> lanes
    attn = jnp.dot(o_flat.astype(bf16), wo, preferred_element_type=f32)    # single O-projection
    h1 = x + attn                                                          # residual 1

    # ---- MLP (SwiGLU), gate/up fused into one matmul ----
    hn = rmsnorm(h1, ln2)
    gu = jnp.dot(hn.astype(bf16), wgu, preferred_element_type=f32)         # (T, 2I)
    gate = gu[:, :INTER]
    up = gu[:, INTER:]
    act = gate * jax.nn.sigmoid(gate) * up                                 # SiLU(gate)*up, f32
    down = jnp.dot(act.astype(bf16), wd_ref[...], preferred_element_type=f32)

    out_ref[...] = h1 + down                                               # residual 2


# ---- wrapper -----------------------------------------------------------------------
@jax.jit
def submodel_forward(input_ids, attention_mask, position_ids, params):
    f32 = jnp.float32
    bf16 = jnp.bfloat16
    ids2d = input_ids.reshape(T, 1).astype(jnp.int32)

    # Rotary cos/sin for the flattened tokens (matches HF LlamaRotaryEmbedding),
    # tiled across heads and with rotate_half sign / half-selection pre-folded.
    inv_freq = 1.0 / (ROPE_THETA ** (jnp.arange(0, HD, 2, dtype=f32) / HD))
    pos = position_ids.reshape(T).astype(f32)
    freqs = pos[:, None] * inv_freq[None, :]                               # (T, HD/2)
    ang = jnp.concatenate([freqs, freqs], axis=-1)                         # (T, HD)
    cos8, sin8 = jnp.cos(ang), jnp.sin(ang)
    half = HD // 2
    zeros = jnp.zeros((T, half), f32)
    ssl8 = jnp.concatenate([-sin8[:, :half], zeros], axis=-1)              # -sin on low half
    ssr8 = jnp.concatenate([zeros, sin8[:, half:]], axis=-1)               # +sin on high half
    cos_flat = jnp.tile(cos8, (1, NH))                                     # (T, HIDDEN)
    ssl_flat = jnp.tile(ssl8, (1, NH))
    ssr_flat = jnp.tile(ssr8, (1, NH))

    # Block-diagonal additive mask over flattened tokens: within-batch entries come from the
    # HF (B,1,S,S) mask, cross-batch entries are fully masked.
    same_batch = jnp.eye(B, dtype=bool)[:, None, :, None]                  # (B,1,B,1)
    blocks = attention_mask[:, 0][:, :, None, :]                           # (B,S,1,S)
    mask_bd = jnp.where(same_batch, blocks, NEG).reshape(T, T).astype(f32)

    ln1_b = jnp.broadcast_to(params["ln1"].reshape(1, HIDDEN), (T, HIDDEN)).astype(f32)
    ln2_b = jnp.broadcast_to(params["ln2"].reshape(1, HIDDEN), (T, HIDDEN)).astype(f32)

    # one packed f32 constant slab (T, 176)
    const_slab = jnp.concatenate(
        [cos_flat, ssl_flat, ssr_flat, ln1_b, ln2_b, mask_bd], axis=-1).astype(f32)

    # one packed bf16 weight slab (HIDDEN, 256): [ q*scale | k | v | o | gate | up ]
    scale = 1.0 / (HD ** 0.5)
    w_slab = jnp.concatenate(
        [params["wq"] * scale, params["wk"], params["wv"],
         params["wo"], params["wg"], params["wu"]], axis=-1).astype(bf16)
    wd = params["wd"].astype(bf16)                                         # (INTER, HIDDEN)

    vmem = lambda: pl.BlockSpec(memory_space=pltpu.MemorySpace.VMEM)
    out = pl.pallas_call(
        decoder_layer_kernel,
        out_shape=jax.ShapeDtypeStruct((T, HIDDEN), jnp.float32),
        in_specs=[vmem() for _ in range(5)],     # whole arrays resident in VMEM, no grid
        out_specs=vmem(),
    )(ids2d, params["embed"], const_slab, w_slab, wd)
    return out.reshape(B, S, HIDDEN)


# ---- pure-JAX reference (f32 math) for correctness check ---------------------------
def reference_forward(input_ids, attention_mask, position_ids, params):
    inv_freq = 1.0 / (ROPE_THETA ** (jnp.arange(0, HD, 2, dtype=jnp.float32) / HD))
    freqs = position_ids.astype(jnp.float32)[..., None] * inv_freq[None, None, :]
    ang = jnp.concatenate([freqs, freqs], axis=-1)
    cos = jnp.cos(ang)[:, :, None, :]
    sin = jnp.sin(ang)[:, :, None, :]

    def rms(t, w):
        return t * jax.lax.rsqrt(jnp.mean(t * t, axis=-1, keepdims=True) + EPS) * w

    x = params["embed"][input_ids]                                      # (B, S, H)
    xn = rms(x, params["ln1"][0])
    q = (xn @ params["wq"]).reshape(B, S, NH, HD)
    k = (xn @ params["wk"]).reshape(B, S, NH, HD)
    v = (xn @ params["wv"]).reshape(B, S, NH, HD)

    def rope(t):
        t1, t2 = t[..., : HD // 2], t[..., HD // 2:]
        return t * cos + jnp.concatenate([-t2, t1], axis=-1) * sin

    q, k = rope(q), rope(k)
    scores = jnp.einsum("bqhd,bkhd->bhqk", q, k) / (HD ** 0.5) + attention_mask
    p = jax.nn.softmax(scores, axis=-1)
    attn = jnp.einsum("bhqk,bkhd->bqhd", p, v).reshape(B, S, HIDDEN)
    h1 = x + attn @ params["wo"]
    hn = rms(h1, params["ln2"][0])
    return h1 + (jax.nn.silu(hn @ params["wg"]) * (hn @ params["wu"])) @ params["wd"]


def make_params(key):
    # NOTE: PyTorch nn.Linear stores W as [out, in] and computes x @ W.T; since the
    # weights are synthetic random init we store them as [in, out] and compute x @ W.
    ks = jax.random.split(key, 9)
    scale = 0.02
    return {
        "embed": scale * jax.random.normal(ks[0], (VOCAB, HIDDEN), jnp.float32),
        "wq": scale * jax.random.normal(ks[1], (HIDDEN, HIDDEN), jnp.float32),
        "wk": scale * jax.random.normal(ks[2], (HIDDEN, HIDDEN), jnp.float32),
        "wv": scale * jax.random.normal(ks[3], (HIDDEN, HIDDEN), jnp.float32),
        "wo": scale * jax.random.normal(ks[4], (HIDDEN, HIDDEN), jnp.float32),
        "wg": scale * jax.random.normal(ks[5], (HIDDEN, INTER), jnp.float32),
        "wu": scale * jax.random.normal(ks[6], (HIDDEN, INTER), jnp.float32),
        "wd": scale * jax.random.normal(ks[7], (INTER, HIDDEN), jnp.float32),
        "ln1": jnp.ones((1, HIDDEN), jnp.float32),
        "ln2": jnp.ones((1, HIDDEN), jnp.float32),
    }


if __name__ == "__main__":
    key = jax.random.PRNGKey(0)
    kp, kid = jax.random.split(key)
    params = make_params(kp)

    input_ids = jax.random.randint(kid, (B, S), 0, VOCAB, dtype=jnp.int32)
    position_ids = jnp.broadcast_to(jnp.arange(S, dtype=jnp.int32)[None, :], (B, S))
    # HF-style additive causal mask: 0 where attended, large negative where masked.
    causal = jnp.tril(jnp.ones((S, S), jnp.float32))
    attention_mask = jnp.where(causal == 1.0, 0.0, NEG)[None, None, :, :]
    attention_mask = jnp.broadcast_to(attention_mask, (B, 1, S, S))

    out = submodel_forward(input_ids, attention_mask, position_ids, params)
    out = jax.block_until_ready(out)

    ref = reference_forward(input_ids, attention_mask, position_ids, params)
    assert out.shape == (B, S, HIDDEN) and out.dtype == jnp.float32
    # tolerance relaxed slightly vs pure-f32 because MXU operands are bf16 (accumulation is f32)
    assert jnp.allclose(out, ref, atol=2e-3, rtol=2e-3), "Pallas kernel mismatch vs reference"

    print("KERNEL_OK")
</pallas_src>

<mosaic_0001>
module attributes {stable_mosaic.version = 11 : i64} {
  func.func @decoder_layer_kernel(%arg0: memref<16x1xi32, #tpu.memory_space<vmem>>, %arg1: memref<128x32xf32, #tpu.memory_space<vmem>>, %arg2: memref<16x176xf32, #tpu.memory_space<vmem>>, %arg3: memref<32x256xbf16, #tpu.memory_space<vmem>>, %arg4: memref<64x32xbf16, #tpu.memory_space<vmem>>, %arg5: memref<16x32xf32, #tpu.memory_space<vmem>>) attributes {dimension_semantics = [], scalar_prefetch = 0 : i64, scratch_operands = 0 : i64, tpu.core_type = #tpu.core_type<tc>} {
    %c0 = arith.constant 0 : index
    %c0_0 = arith.constant 0 : index
    %0 = vector.load %arg2[%c0, %c0_0] : memref<16x176xf32, #tpu.memory_space<vmem>>, vector<16x32xf32>
    %c0_1 = arith.constant 0 : index
    %c32 = arith.constant 32 : index
    %1 = vector.load %arg2[%c0_1, %c32] : memref<16x176xf32, #tpu.memory_space<vmem>>, vector<16x32xf32>
    %c0_2 = arith.constant 0 : index
    %c64 = arith.constant 64 : index
    %2 = vector.load %arg2[%c0_2, %c64] : memref<16x176xf32, #tpu.memory_space<vmem>>, vector<16x32xf32>
    %c0_3 = arith.constant 0 : index
    %c96 = arith.constant 96 : index
    %3 = vector.load %arg2[%c0_3, %c96] : memref<16x176xf32, #tpu.memory_space<vmem>>, vector<16x32xf32>
    %c0_4 = arith.constant 0 : index
    %c128 = arith.constant 128 : index
    %4 = vector.load %arg2[%c0_4, %c128] : memref<16x176xf32, #tpu.memory_space<vmem>>, vector<16x32xf32>
    %c0_5 = arith.constant 0 : index
    %c160 = arith.constant 160 : index
    %5 = vector.load %arg2[%c0_5, %c160] : memref<16x176xf32, #tpu.memory_space<vmem>>, vector<16x16xf32>
    %c0_6 = arith.constant 0 : index
    %c0_7 = arith.constant 0 : index
    %6 = vector.load %arg3[%c0_6, %c0_7] : memref<32x256xbf16, #tpu.memory_space<vmem>>, vector<32x96xbf16>
    %c0_8 = arith.constant 0 : index
    %c96_9 = arith.constant 96 : index
    %7 = vector.load %arg3[%c0_8, %c96_9] : memref<32x256xbf16, #tpu.memory_space<vmem>>, vector<32x32xbf16>
    %c0_10 = arith.constant 0 : index
    %c128_11 = arith.constant 128 : index
    %8 = vector.load %arg3[%c0_10, %c128_11] : memref<32x256xbf16, #tpu.memory_space<vmem>>, vector<32x128xbf16>
    %c0_12 = arith.constant 0 : index
    %c0_13 = arith.constant 0 : index
    %9 = vector.load %arg0[%c0_12, %c0_13] : memref<16x1xi32, #tpu.memory_space<vmem>>, vector<16x1xi32>
    %10 = tpu.iota {dimensions = array<i32: 1>} : vector<16x128xi32>
    %11 = vector.broadcast %9 : vector<16x1xi32> to vector<16x128xi32>
    %12 = arith.cmpi eq, %11, %10 : vector<16x128xi32>
    %13 = arith.extui %12 : vector<16x128xi1> to vector<16x128xi32>
    %14 = arith.sitofp %13 : vector<16x128xi32> to vector<16x128xf32>
    %c0_14 = arith.constant 0 : index
    %c0_15 = arith.constant 0 : index
    %15 = vector.load %arg1[%c0_14, %c0_15] : memref<128x32xf32, #tpu.memory_space<vmem>>, vector<128x32xf32>
    %cst = arith.constant dense<0.000000e+00> : vector<16x32xf32>
    %16 = tpu.matmul %14, %15, %cst {dimension_numbers = #tpu.dot_dimension_numbers<[1], [0], [0], [1], [0, 0, 1, 1], [], []>} : vector<16x128xf32>, vector<128x32xf32>, vector<16x32xf32> -> vector<16x32xf32>
    %17 = arith.mulf %16, %16 : vector<16x32xf32>
    %cst_16 = arith.constant dense<0.000000e+00> : vector<16xf32>
    %18 = vector.multi_reduction <add>, %17, %cst_16 [1] : vector<16x32xf32> to vector<16xf32>
    %19 = vector.shape_cast %18 : vector<16xf32> to vector<16x1xf32>
    %cst_17 = arith.constant 3.200000e+01 : f32
    %20 = vector.broadcast %cst_17 : f32 to vector<16x1xf32>
    %21 = arith.divf %19, %20 : vector<16x1xf32>
    %cst_18 = arith.constant 9.99999997E-7 : f32
    %22 = vector.broadcast %cst_18 : f32 to vector<16x1xf32>
    %23 = arith.addf %21, %22 : vector<16x1xf32>
    %24 = math.rsqrt %23 : vector<16x1xf32>
    %25 = vector.broadcast %24 : vector<16x1xf32> to vector<16x32xf32>
    %26 = arith.mulf %16, %25 : vector<16x32xf32>
    %27 = arith.mulf %26, %3 : vector<16x32xf32>
    %28 = arith.truncf %27 : vector<16x32xf32> to vector<16x32xbf16>
    %cst_19 = arith.constant dense<0.000000e+00> : vector<16x96xf32>
    %29 = tpu.matmul %28, %6, %cst_19 {dimension_numbers = #tpu.dot_dimension_numbers<[1], [0], [0], [1], [0, 0, 1, 1], [], []>} : vector<16x32xbf16>, vector<32x96xbf16>, vector<16x96xf32> -> vector<16x96xf32>
    %30 = vector.extract_strided_slice %29 {offsets = [0, 0], sizes = [16, 32], strides = [1, 1]} : vector<16x96xf32> to vector<16x32xf32>
    %31 = vector.extract_strided_slice %29 {offsets = [0, 32], sizes = [16, 32], strides = [1, 1]} : vector<16x96xf32> to vector<16x32xf32>
    %32 = vector.extract_strided_slice %29 {offsets = [0, 64], sizes = [16, 32], strides = [1, 1]} : vector<16x96xf32> to vector<16x32xf32>
    %33 = vector.extract_strided_slice %30 {offsets = [0, 4], sizes = [16, 28], strides = [1, 1]} : vector<16x32xf32> to vector<16x28xf32>
    %34 = vector.extract_strided_slice %30 {offsets = [0, 0], sizes = [16, 4], strides = [1, 1]} : vector<16x32xf32> to vector<16x4xf32>
    %35 = tpu.concatenate %33, %34 in 1 : vector<16x28xf32>, vector<16x4xf32> -> vector<16x32xf32>
    %36 = vector.extract_strided_slice %30 {offsets = [0, 28], sizes = [16, 4], strides = [1, 1]} : vector<16x32xf32> to vector<16x4xf32>
    %37 = vector.extract_strided_slice %30 {offsets = [0, 0], sizes = [16, 28], strides = [1, 1]} : vector<16x32xf32> to vector<16x28xf32>
    %38 = tpu.concatenate %36, %37 in 1 : vector<16x4xf32>, vector<16x28xf32> -> vector<16x32xf32>
    %39 = arith.mulf %30, %0 : vector<16x32xf32>
    %40 = arith.mulf %35, %1 : vector<16x32xf32>
    %41 = arith.addf %39, %40 : vector<16x32xf32>
    %42 = arith.mulf %38, %2 : vector<16x32xf32>
    %43 = arith.addf %41, %42 : vector<16x32xf32>
    %44 = vector.extract_strided_slice %31 {offsets = [0, 4], sizes = [16, 28], strides = [1, 1]} : vector<16x32xf32> to vector<16x28xf32>
    %45 = vector.extract_strided_slice %31 {offsets = [0, 0], sizes = [16, 4], strides = [1, 1]} : vector<16x32xf32> to vector<16x4xf32>
    %46 = tpu.concatenate %44, %45 in 1 : vector<16x28xf32>, vector<16x4xf32> -> vector<16x32xf32>
    %47 = vector.extract_strided_slice %31 {offsets = [0, 28], sizes = [16, 4], strides = [1, 1]} : vector<16x32xf32> to vector<16x4xf32>
    %48 = vector.extract_strided_slice %31 {offsets = [0, 0], sizes = [16, 28], strides = [1, 1]} : vector<16x32xf32> to vector<16x28xf32>
    %49 = tpu.concatenate %47, %48 in 1 : vector<16x4xf32>, vector<16x28xf32> -> vector<16x32xf32>
    %50 = arith.mulf %31, %0 : vector<16x32xf32>
    %51 = arith.mulf %46, %1 : vector<16x32xf32>
    %52 = arith.addf %50, %51 : vector<16x32xf32>
    %53 = arith.mulf %49, %2 : vector<16x32xf32>
    %54 = arith.addf %52, %53 : vector<16x32xf32>
    %55 = vector.extract_strided_slice %43 {offsets = [0, 0], sizes = [16, 8], strides = [1, 1]} : vector<16x32xf32> to vector<16x8xf32>
    %56 = vector.extract_strided_slice %43 {offsets = [0, 8], sizes = [16, 8], strides = [1, 1]} : vector<16x32xf32> to vector<16x8xf32>
    %57 = vector.extract_strided_slice %43 {offsets = [0, 16], sizes = [16, 8], strides = [1, 1]} : vector<16x32xf32> to vector<16x8xf32>
    %58 = vector.extract_strided_slice %43 {offsets = [0, 24], sizes = [16, 8], strides = [1, 1]} : vector<16x32xf32> to vector<16x8xf32>
    %59 = vector.shape_cast %55 : vector<16x8xf32> to vector<1x16x8xf32>
    %60 = vector.shape_cast %56 : vector<16x8xf32> to vector<1x16x8xf32>
    %61 = vector.shape_cast %57 : vector<16x8xf32> to vector<1x16x8xf32>
    %62 = vector.shape_cast %58 : vector<16x8xf32> to vector<1x16x8xf32>
    %63 = tpu.concatenate %59, %60, %61, %62 in 0 : vector<1x16x8xf32>, vector<1x16x8xf32>, vector<1x16x8xf32>, vector<1x16x8xf32> -> vector<4x16x8xf32>
    %64 = arith.truncf %63 : vector<4x16x8xf32> to vector<4x16x8xbf16>
    %65 = vector.extract_strided_slice %54 {offsets = [0, 0], sizes = [16, 8], strides = [1, 1]} : vector<16x32xf32> to vector<16x8xf32>
    %66 = vector.extract_strided_slice %54 {offsets = [0, 8], sizes = [16, 8], strides = [1, 1]} : vector<16x32xf32> to vector<16x8xf32>
    %67 = vector.extract_strided_slice %54 {offsets = [0, 16], sizes = [16, 8], strides = [1, 1]} : vector<16x32xf32> to vector<16x8xf32>
    %68 = vector.extract_strided_slice %54 {offsets = [0, 24], sizes = [16, 8], strides = [1, 1]} : vector<16x32xf32> to vector<16x8xf32>
    %69 = vector.shape_cast %65 : vector<16x8xf32> to vector<1x16x8xf32>
    %70 = vector.shape_cast %66 : vector<16x8xf32> to vector<1x16x8xf32>
    %71 = vector.shape_cast %67 : vector<16x8xf32> to vector<1x16x8xf32>
    %72 = vector.shape_cast %68 : vector<16x8xf32> to vector<1x16x8xf32>
    %73 = tpu.concatenate %69, %70, %71, %72 in 0 : vector<1x16x8xf32>, vector<1x16x8xf32>, vector<1x16x8xf32>, vector<1x16x8xf32> -> vector<4x16x8xf32>
    %74 = arith.truncf %73 : vector<4x16x8xf32> to vector<4x16x8xbf16>
    %75 = vector.extract_strided_slice %32 {offsets = [0, 0], sizes = [16, 8], strides = [1, 1]} : vector<16x32xf32> to vector<16x8xf32>
    %76 = vector.extract_strided_slice %32 {offsets = [0, 8], sizes = [16, 8], strides = [1, 1]} : vector<16x32xf32> to vector<16x8xf32>
    %77 = vector.extract_strided_slice %32 {offsets = [0, 16], sizes = [16, 8], strides = [1, 1]} : vector<16x32xf32> to vector<16x8xf32>
    %78 = vector.extract_strided_slice %32 {offsets = [0, 24], sizes = [16, 8], strides = [1, 1]} : vector<16x32xf32> to vector<16x8xf32>
    %79 = vector.shape_cast %75 : vector<16x8xf32> to vector<1x16x8xf32>
    %80 = vector.shape_cast %76 : vector<16x8xf32> to vector<1x16x8xf32>
    %81 = vector.shape_cast %77 : vector<16x8xf32> to vector<1x16x8xf32>
    %82 = vector.shape_cast %78 : vector<16x8xf32> to vector<1x16x8xf32>
    %83 = tpu.concatenate %79, %80, %81, %82 in 0 : vector<1x16x8xf32>, vector<1x16x8xf32>, vector<1x16x8xf32>, vector<1x16x8xf32> -> vector<4x16x8xf32>
    %84 = arith.truncf %83 : vector<4x16x8xf32> to vector<4x16x8xbf16>
    "tpu.trace_start"() <{level = 10 : i32, message = "nqd,nkd->nqk"}> : () -> ()
    %cst_20 = arith.constant dense<0.000000e+00> : vector<4x16x16xf32>
    %85 = tpu.matmul %64, %74, %cst_20 {dimension_numbers = #tpu.dot_dimension_numbers<[2], [2], [1], [1], [0, 0, 0, 1, 1, 1], [0], [0]>} : vector<4x16x8xbf16>, vector<4x16x8xbf16>, vector<4x16x16xf32> -> vector<4x16x16xf32>
    "tpu.trace_stop"() : () -> ()
    %86 = vector.shape_cast %5 : vector<16x16xf32> to vector<1x16x16xf32>
    %87 = vector.broadcast %86 : vector<1x16x16xf32> to vector<4x16x16xf32>
    %88 = arith.addf %85, %87 : vector<4x16x16xf32>
    %cst_21 = arith.constant dense<0xFF800000> : vector<4x16xf32>
    %89 = vector.multi_reduction <maximumf>, %88, %cst_21 [2] : vector<4x16x16xf32> to vector<4x16xf32>
    %90 = vector.shape_cast %89 : vector<4x16xf32> to vector<4x16x1xf32>
    %91 = vector.broadcast %90 : vector<4x16x1xf32> to vector<4x16x16xf32>
    %92 = arith.subf %88, %91 : vector<4x16x16xf32>
    %93 = math.exp %92 : vector<4x16x16xf32>
    %cst_22 = arith.constant dense<0.000000e+00> : vector<4x16xf32>
    %94 = vector.multi_reduction <add>, %93, %cst_22 [2] : vector<4x16x16xf32> to vector<4x16xf32>
    %95 = vector.shape_cast %94 : vector<4x16xf32> to vector<4x16x1xf32>
    %96 = tpu.reciprocal %95 {approx = true} : vector<4x16x1xf32> -> vector<4x16x1xf32>
    %97 = vector.broadcast %96 : vector<4x16x1xf32> to vector<4x16x16xf32>
    %98 = arith.mulf %93, %97 : vector<4x16x16xf32>
    %99 = arith.truncf %98 : vector<4x16x16xf32> to vector<4x16x16xbf16>
    "tpu.trace_start"() <{level = 10 : i32, message = "nqk,nkd->nqd"}> : () -> ()
    %cst_23 = arith.constant dense<0.000000e+00> : vector<4x16x8xf32>
    %100 = tpu.matmul %99, %84, %cst_23 {dimension_numbers = #tpu.dot_dimension_numbers<[2], [1], [1], [2], [0, 0, 0, 1, 1, 2], [0], [0]>} : vector<4x16x16xbf16>, vector<4x16x8xbf16>, vector<4x16x8xf32> -> vector<4x16x8xf32>
    "tpu.trace_stop"() : () -> ()
    %101 = vector.extract_strided_slice %100 {offsets = [0, 0, 0], sizes = [1, 16, 8], strides = [1, 1, 1]} : vector<4x16x8xf32> to vector<1x16x8xf32>
    %102 = vector.shape_cast %101 : vector<1x16x8xf32> to vector<16x8xf32>
    %103 = vector.extract_strided_slice %100 {offsets = [1, 0, 0], sizes = [1, 16, 8], strides = [1, 1, 1]} : vector<4x16x8xf32> to vector<1x16x8xf32>
    %104 = vector.shape_cast %103 : vector<1x16x8xf32> to vector<16x8xf32>
    %105 = vector.extract_strided_slice %100 {offsets = [2, 0, 0], sizes = [1, 16, 8], strides = [1, 1, 1]} : vector<4x16x8xf32> to vector<1x16x8xf32>
    %106 = vector.shape_cast %105 : vector<1x16x8xf32> to vector<16x8xf32>
    %107 = vector.extract_strided_slice %100 {offsets = [3, 0, 0], sizes = [1, 16, 8], strides = [1, 1, 1]} : vector<4x16x8xf32> to vector<1x16x8xf32>
    %108 = vector.shape_cast %107 : vector<1x16x8xf32> to vector<16x8xf32>
    %109 = tpu.concatenate %102, %104, %106, %108 in 1 : vector<16x8xf32>, vector<16x8xf32>, vector<16x8xf32>, vector<16x8xf32> -> vector<16x32xf32>
    %110 = arith.truncf %109 : vector<16x32xf32> to vector<16x32xbf16>
    %cst_24 = arith.constant dense<0.000000e+00> : vector<16x32xf32>
    %111 = tpu.matmul %110, %7, %cst_24 {dimension_numbers = #tpu.dot_dimension_numbers<[1], [0], [0], [1], [0, 0, 1, 1], [], []>} : vector<16x32xbf16>, vector<32x32xbf16>, vector<16x32xf32> -> vector<16x32xf32>
    %112 = arith.addf %16, %111 : vector<16x32xf32>
    %113 = arith.mulf %112, %112 : vector<16x32xf32>
    %cst_25 = arith.constant dense<0.000000e+00> : vector<16xf32>
    %114 = vector.multi_reduction <add>, %113, %cst_25 [1] : vector<16x32xf32> to vector<16xf32>
    %115 = vector.shape_cast %114 : vector<16xf32> to vector<16x1xf32>
    %cst_26 = arith.constant 3.200000e+01 : f32
    %116 = vector.broadcast %cst_26 : f32 to vector<16x1xf32>
    %117 = arith.divf %115, %116 : vector<16x1xf32>
    %cst_27 = arith.constant 9.99999997E-7 : f32
    %118 = vector.broadcast %cst_27 : f32 to vector<16x1xf32>
    %119 = arith.addf %117, %118 : vector<16x1xf32>
    %120 = math.rsqrt %119 : vector<16x1xf32>
    %121 = vector.broadcast %120 : vector<16x1xf32> to vector<16x32xf32>
    %122 = arith.mulf %112, %121 : vector<16x32xf32>
    %123 = arith.mulf %122, %4 : vector<16x32xf32>
    %124 = arith.truncf %123 : vector<16x32xf32> to vector<16x32xbf16>
    %cst_28 = arith.constant dense<0.000000e+00> : vector<16x128xf32>
    %125 = tpu.matmul %124, %8, %cst_28 {dimension_numbers = #tpu.dot_dimension_numbers<[1], [0], [0], [1], [0, 0, 1, 1], [], []>} : vector<16x32xbf16>, vector<32x128xbf16>, vector<16x128xf32> -> vector<16x128xf32>
    %126 = vector.extract_strided_slice %125 {offsets = [0, 0], sizes = [16, 64], strides = [1, 1]} : vector<16x128xf32> to vector<16x64xf32>
    %127 = vector.extract_strided_slice %125 {offsets = [0, 64], sizes = [16, 64], strides = [1, 1]} : vector<16x128xf32> to vector<16x64xf32>
    %128 = arith.negf %126 : vector<16x64xf32>
    %129 = math.exp %128 : vector<16x64xf32>
    %cst_29 = arith.constant 1.000000e+00 : f32
    %130 = vector.broadcast %cst_29 : f32 to vector<16x64xf32>
    %131 = arith.addf %130, %129 : vector<16x64xf32>
    %132 = arith.divf %130, %131 : vector<16x64xf32>
    %133 = arith.mulf %126, %132 : vector<16x64xf32>
    %134 = arith.mulf %133, %127 : vector<16x64xf32>
    %135 = arith.truncf %134 : vector<16x64xf32> to vector<16x64xbf16>
    %c0_30 = arith.constant 0 : index
    %c0_31 = arith.constant 0 : index
    %136 = vector.load %arg4[%c0_30, %c0_31] : memref<64x32xbf16, #tpu.memory_space<vmem>>, vector<64x32xbf16>
    %cst_32 = arith.constant dense<0.000000e+00> : vector<16x32xf32>
    %137 = tpu.matmul %135, %136, %cst_32 {dimension_numbers = #tpu.dot_dimension_numbers<[1], [0], [0], [1], [0, 0, 1, 1], [], []>} : vector<16x64xbf16>, vector<64x32xbf16>, vector<16x32xf32> -> vector<16x32xf32>
    %138 = arith.addf %112, %137 : vector<16x32xf32>
    %c0_33 = arith.constant 0 : index
    %c0_34 = arith.constant 0 : index
    %139 = vector.load %arg5[%c0_33, %c0_34] : memref<16x32xf32, #tpu.memory_space<vmem>>, vector<16x32xf32>
    tpu.vector_store %arg5[%c0_33, %c0_34], %138 {strides = array<i32>} : memref<16x32xf32, #tpu.memory_space<vmem>>, vector<16x32xf32>,
    return
  }
}

</mosaic_0001>

<bundles_post_ra>
// kernel: submodel_forward.1
= control target key start
LH: loop header
LB: loop body
LE: loop exit
PB: predicated region body
PF: predicated region fallthrough
CT: control target
= control target key end

     0   :  { %v1554_v2 = vmov 0   ;;  %s1953_s0 = inlined_call_operand.vmem [shape: s32[16,1], index: 0, kind: input, shape index: {}]   ;;  %s1954_s1 = inlined_call_operand.vmem [shape: f32[128,32], index: 1, kind: input, shape index: {}]   ;;  %s1955_s2 = inlined_call_operand.vmem [shape: f32[16,176], index: 2, kind: input, shape index: {}]   ;;  %s1956_s3 = inlined_call_operand.vmem [shape: bf16[32,256], index: 3, kind: input, shape index: {}]   ;;  %s1957_s4 = inlined_call_operand.vmem [shape: bf16[64,32], index: 4, kind: input, shape index: {}]   ;;  %s1958_s5 = inlined_call_operand.hbm [shape: f32[16,32], index: 5, kind: output, shape index: {}]  }
   0x1   :  { %v34_v0 = vld [vmem:[%s1953_s0] sm:$0xff]  ;;  %1413 = vset.pattern.permute.xlu0 %v1554_v2  ;;  %v51_v3 = vld [vmem:[%s1954_s1 + $0x8] sm:$0xff]  ;;  %v52_v4 = vld [vmem:[%s1954_s1 + $0x10] sm:$0xff] }
   0x2   :  { %v50_v1 = vld [vmem:[%s1954_s1] sm:$0xff]  ;;  %v53_v5 = vld [vmem:[%s1954_s1 + $0x18] sm:$0xff]  ;;  %39 = vperm.xlu0 %1413, %v34_v0   ;;  %v35_v8 = vld [vmem:[%s1953_s0 + $0x8] sm:$0xff] }
   0x3   :  { %v1360_v6 = vpack.c.bf16 %v51_v3, %v50_v1  ;;  %v1364_v7 = vpack.c.bf16 %v53_v5, %v52_v4  ;;  %v54_v9 = vld [vmem:[%s1954_s1 + $0x20] sm:$0xff]  ;;  %v55_v10 = vld [vmem:[%s1954_s1 + $0x28] sm:$0xff]  ;;  %v56_v11 = vld [vmem:[%s1954_s1 + $0x30] sm:$0xff] }
   0x4   :  { %v57_v12 = vld [vmem:[%s1954_s1 + $0x38] sm:$0xff]  ;;  %v1368_v13 = vpack.c.bf16 %v55_v10, %v54_v9  ;;  %v58_v14 = vld [vmem:[%s1954_s1 + $0x40] sm:$0xff]  ;;  %v59_v16 = vld [vmem:[%s1954_s1 + $0x48] sm:$0xff] }
   0x5   :  { %1361 = vmatprep.subr.bf16.mxu0 %v1360_v6  ;;  %v1372_v15 = vpack.c.bf16 %v57_v12, %v56_v11 }
   0x6   :  { %1363 = vmatpush3.bf16.msra.mxu0 %v1360_v6  ;;  %42 = vperm.xlu0 %1413, %v35_v8  }
   0x7   :  { %1365 = vmatprep.subr.bf16.mxu0 %v1364_v7 }
   0xa   :  { %1367 = vmatpush3.bf16.msra.mxu0 %v1364_v7 }
   0xb   :  { %1369 = vmatprep.subr.bf16.mxu0 %v1368_v13 }
   0xc   :  { %10 = vsyncpa [#allocation3], 0  ;;  %v1376_v17 = vpack.c.bf16 %v59_v16, %v58_v14  ;;  %v60_v18 = vld [vmem:[%s1954_s1 + $0x50] sm:$0xff]  ;;  %v61_v19 = vld [vmem:[%s1954_s1 + $0x58] sm:$0xff]  ;;  %v36_v27 = vlaneseq  ;;  %v1555_v30 = vmov 1.0   ;;  %vm143_vm2 = vcmask 261120  }
   0xd   :  { %v1380_v20 = vpack.c.bf16 %v61_v19, %v60_v18  ;;  %v62_v21 = vld [vmem:[%s1954_s1 + $0x60] sm:$0xff]  ;;  %v63_v22 = vld [vmem:[%s1954_s1 + $0x68] sm:$0xff]  ;;  %v64_v24 = vld [vmem:[%s1954_s1 + $0x70] sm:$0xff]  ;;  %v1557_v41 = vmov 0.0   ;;  %vm1558_vm3 = vmmov 0   ;;  %s1559_s11 = smov 96  }
   0xe   :  { %1371 = vmatpush3.bf16.msra.mxu0 %v1368_v13  ;;  %v1384_v23 = vpack.c.bf16 %v63_v22, %v62_v21  ;;  %v65_v25 = vld [vmem:[%s1954_s1 + $0x78] sm:$0xff]  ;;  %v37_v28 = vand.u32 127, %v36_v27  ;;  %v1662_v32 = vld [vmem:[%s1955_s2] sm:$0xff]  ;;  %s1556_s1 = smov 32   ;;  %v1679_v39 = vld [vmem:[%s1955_s2 + $0x10] sm:$0xff]  ;;  %1276 = vmatprep.subr.bf16.mxu1 %v1557_v41  ;;  %s1560_s12 = smov 100  }
   0xf   :  { %1373 = vmatprep.subr.bf16.mxu0 %v1372_v15  ;;  %v1388_v26 = vpack.c.bf16 %v65_v25, %v64_v24  ;;  %161 = vrot.lane.b32.xlu0 %v1662_v32, %s1556_s1  ;;  %v1686_v40 = vld [vmem:[%s1956_s3] ss:$8 sps:$4 sm:$0xff]   ;;  %v1695_v42 = vld [vmem:[%s1956_s3 + $0x10] ss:$8 sps:$4 sm:$0xff]   ;;  %s1561_s0 = smov 124   ;;  %s1562_s13 = smov 68  }
  0x10   :  { %1277 = vmatpush3.bf16.msra.mxu1 %v1686_v40  ;;  %1280 = vmatprep.mubr.msk.bf16.mxu1 %vm1558_vm3, %v1557_v41  ;;  %s1563_s14 = smov 92   ;;  %s1564_s15 = smov 64   ;;  %vm240_vm4 = vcmask 228352   ;;  %vm255_vm5 = vcmask 31744   ;;  %vm403_vm6 = vcmask 64512   ;;  %vm601_vm7 = vcmask 130048  }
  0x11   :  { %1278 = vmatprep.subr.bf16.mxu1 %v1557_v41  ;;  %s1565_s16 = smov 28   ;;  %s1566_s17 = smov 4   ;;  %vm914_vm8 = vcmask 195584   ;;  %vm1102_vm9 = vcmask 523264  }
  0x12   :  { %1375 = vmatpush3.bf16.msra.mxu0 %v1372_v15  ;;  %s1567_s18 = smov 112   ;;  %s1568_s19 = smov 120  }
  0x13   :  { %1377 = vmatprep.subr.bf16.mxu0 %v1376_v17  ;;  %262 = vrot.lane.b32.xlu0 %v1679_v39, %s1559_s11  ;;  %s1569_s20 = smov 104   ;;  %s1571_s25 = smov 24  }
  0x14   :  { %1279 = vmatpush3.bf16.msra.mxu1 %v1695_v42  ;;  %s1572_s26 = smov 16  }
  0x15   :  { %1284 = vmatprep.subr.bf16.mxu1 %v1557_v41 }
  0x16   :  { %1379 = vmatpush3.bf16.msra.mxu0 %v1376_v17 }
  0x17   :  { %1381 = vmatprep.subr.bf16.mxu0 %v1380_v20 }
  0x1a   :  { %1383 = vmatpush3.bf16.msra.mxu0 %v1380_v20 }
  0x1b   :  { %1385 = vmatprep.subr.bf16.mxu0 %v1384_v23 }
  0x1e   :  { %1387 = vmatpush3.bf16.msra.mxu0 %v1384_v23 }
  0x1f   :  { %1389 = vmatprep.subr.bf16.mxu0 %v1388_v26 }
  0x22   :  { %1391 = vmatpush3.bf16.msra.mxu0 %v1388_v26 }
  0x23   :  { %1302 = vmatprep.subr.bf16.mxu0 %v1557_v41 }
  0x81   :  { %v40_v29 = vpop.permute.xlu0 %39 }
  0x82   :  { %vm44_vm0 = vcmp.eq.s32.totalorder %v40_v29, %v37_v28 }
  0x83   :  { %1273 = vmatprep.mubr.msk.f32.mxu0 %vm44_vm0, %v1555_v30 }
  0x85   :  { %v43_v31 = vpop.permute.xlu0 %42 }
  0x86   :  { %vm45_vm1 = vcmp.eq.s32.totalorder %v43_v31, %v37_v28 }
  0x87   :  { %1274 = vmatmul.mubr.msk.f32.vlgmr.msra.gmra.mrb[0].mxu0 %vm45_vm1, %v1555_v30 }
  0x88   :  { %1304 = vmatprep.mubr.msk.bf16.mxu0 %vm1558_vm3, %v1557_v41 }
  0x89   :  { %v162_v53 = vpop.permute.xlu0 %161 }
  0x8d   :  { %v263_v1 = vpop.permute.xlu0 %262 }
 0x15a   :  { %v1666_v33 = vpop.f32.mrb[0].mxu0 }
 0x15b   :  { %v1668_v34 = vpop.f32.mrb[1].mxu0  ;;  %v142_v35 = vmul.f32 %v1666_v33, %v1666_v33 }
 0x15c   :  { %v141_v37 = vmul.f32 %v1668_v34, %v1668_v34 }
 0x15d   :  { %v147_v36 = vsel %vm143_vm2, %v142_v35, 0.0 }
 0x15e   :  { %148 = vadd.xlane.f32.xlu1 %v147_v36  ;;  %v144_v38 = vsel %vm143_vm2, %v141_v37, 0.0 }
 0x162   :  { %145 = vadd.xlane.f32.xlu1 %v144_v38 }
 0x173   :  { %163 = vrot.lane.b32.xlu1 %v1679_v39, %s1556_s1 }
 0x177   :  { %260 = vrot.lane.b32.xlu1 %v1662_v32, %s1559_s11 }
 0x1eb   :  { %v149_v43 = vpop.xlane.xlu1 %148 }
 0x1ec   :  { %v152_v44 = vmul.f32 0.03125, %v149_v43 }
 0x1ee   :  { %v154_v45 = vadd.f32 1e-06, %v152_v44 }
 0x1ef   :  { %v146_v46 = vpop.xlane.xlu1 %145 }
 0x1f0   :  { %1482 = vrsqrt.f32 %v154_v45  ;;  %v151_v47 = vmul.f32 0.03125, %v146_v46 }
 0x1f2   :  { %v153_v48 = vadd.f32 1e-06, %v151_v47 }
 0x1f3   :  { %v1708_v52 = vpop.permute.xlu1 %163 }
 0x1f4   :  { %1484 = vrsqrt.f32 %v153_v48 }
 0x1f7   :  { %v261_v0 = vpop.permute.xlu1 %260 }
 0x1fa   :  { %v1483_v49 = vpop.eup %1482 }
 0x1fb   :  { %v158_v50 = vmul.f32 %v1483_v49, %v1666_v33 }
 0x1fd   :  { %v168_v55 = vmul.f32 %v1708_v52, %v158_v50 }
 0x1fe   :  { %v1485_v51 = vpop.eup %1484 }
 0x1ff   :  { %v157_v54 = vmul.f32 %v1485_v51, %v1668_v34 }
 0x201   :  { %v167_v56 = vmul.f32 %v162_v53, %v157_v54 }
 0x203   :  { %v169_v57 = vpack.c.bf16 %v168_v55, %v167_v56 }
 0x205   :  { %1281 = vmatmul.mubr.msk.bf16.vlgmr.msra.gmra.mrb[0].mxu1 %vm143_vm2, %v169_v57 }
 0x206   :  { %1286 = vmatprep.mubr.msk.bf16.mxu1 %vm1558_vm3, %v1557_v41 }
 0x2d8   :  { %v1715_v58 = vpop.f32.mrb[0].mxu1 }
 0x2d9   :  { %243 = vrot.lane.b32.xlu1 %v1715_v58, %s1560_s12  ;;  %228 = vrot.lane.b32.xlu0 %v1715_v58, %s1561_s0  ;;  %v1282_v59 = vpop.f32.mrb[1].mxu1  ;;  %v296_v22 = vmul.f32 %v1715_v58, %v162_v53  ;;  %v258_v55 = vmul.f32 %v1715_v58, %v1662_v32 }
 0x2da   :  { %v1719_v60 = vpop.f32.mrb[2].mxu1 }
 0x2db   :  { %v1283_v61 = vpop.f32.mrb[3].mxu1  ;;  %v1723_v62 = vpack.i.bf16 %v1719_v60, %v1715_v58  ;;  %v388_v63 = vpack.c.bf16 %v1719_v60, %v1715_v58  ;;  %v297_v23 = vmul.f32 %v1719_v60, %v1708_v52  ;;  %v259_v54 = vmul.f32 %v1719_v60, %v1679_v39 }
 0x2dd   :  { %288 = vrot.lane.b32.xlu1 %v1715_v58, %s1562_s13  ;;  %280 = vrot.lane.b32.xlu0 %v1715_v58, %s1563_s14 }
 0x2e1   :  { %270 = vrot.lane.b32.xlu1 %v1662_v32, %s1564_s15  ;;  %230 = vrot.lane.b32.xlu0 %v1719_v60, %s1561_s0 }
 0x2e5   :  { %282 = vrot.lane.b32.xlu0 %v1719_v60, %s1563_s14 }
 0x2e9   :  { %245 = vrot.lane.b32.xlu0 %v1719_v60, %s1560_s12 }
 0x2ed   :  { %290 = vrot.lane.b32.xlu0 %v1719_v60, %s1562_s13 }
 0x2f1   :  { %272 = vrot.lane.b32.xlu0 %v1679_v39, %s1564_s15 }
 0x34b   :  { %v244_v2 = vpop.permute.xlu1 %243  ;;  %v229_v3 = vpop.permute.xlu0 %228 }
 0x34f   :  { %v289_v4 = vpop.permute.xlu1 %288  ;;  %v281_v5 = vpop.permute.xlu0 %280 }
 0x350   :  { %v286_v6 = vsel %vm240_vm4, %v281_v5, %v229_v3  ;;  %v294_v8 = vsel %vm255_vm5, %v289_v4, %v244_v2 }
 0x351   :  { %v298_v7 = vmul.f32 %v286_v6, %v261_v0 }
 0x353   :  { %v271_v9 = vpop.permute.xlu1 %270  ;;  %302 = vrot.lane.b32.xlu1 %v298_v7, %s1556_s1  ;;  %v231_v10 = vpop.permute.xlu0 %230 }
 0x354   :  { %v310_v11 = vmul.f32 %v294_v8, %v271_v9 }
 0x357   :  { %314 = vrot.lane.b32.xlu1 %v310_v11, %s1556_s1  ;;  %v283_v12 = vpop.permute.xlu0 %282  ;;  %v1774_v11 = vld [vmem:[%s1955_s2 + $0x8] sm:$0xff] }
 0x358   :  { %v287_v13 = vsel %vm240_vm4, %v283_v12, %v231_v10  ;;  %v1785_v12 = vld [vmem:[%s1955_s2 + $0x18] sm:$0xff]  ;;  %s1570_s2 = smov 8  }
 0x359   :  { %v299_v14 = vmul.f32 %v287_v13, %v263_v1 }
 0x35b   :  { %236 = vrot.lane.b32.xlu1 %v1719_v60, %s1565_s16  ;;  %304 = vrot.lane.b32.xlu0 %v299_v14, %s1556_s1  ;;  %v246_v15 = vpop.permute.xlu0 %245 }
 0x35f   :  { %v291_v16 = vpop.permute.xlu0 %290 }
 0x360   :  { %v295_v17 = vsel %vm255_vm5, %v291_v16, %v246_v15 }
 0x363   :  { %v273_v18 = vpop.permute.xlu0 %272 }
 0x364   :  { %v311_v19 = vmul.f32 %v295_v17, %v273_v18 }
 0x366   :  { %316 = vrot.lane.b32.xlu0 %v311_v19, %s1556_s1 }
 0x36a   :  { %234 = vrot.lane.b32.xlu0 %v1715_v58, %s1565_s16 }
 0x36e   :  { %249 = vrot.lane.b32.xlu0 %v1715_v58, %s1566_s17 }
 0x3c5   :  { %v303_v20 = vpop.permute.xlu1 %302 }
 0x3c6   :  { %v308_v25 = vadd.f32 %v303_v20, %v296_v22 }
 0x3c9   :  { %v315_v24 = vpop.permute.xlu1 %314 }
 0x3ca   :  { %v320_v28 = vadd.f32 %v315_v24, %v308_v25 }
 0x3cd   :  { %v305_v21 = vpop.permute.xlu0 %304  ;;  %v237_v36 = vpop.permute.xlu1 %236 }
 0x3ce   :  { %v309_v26 = vadd.f32 %v305_v21, %v297_v23  ;;  %v242_v38 = vsel %vm240_vm4, %v231_v10, %v237_v36 }
 0x3cf   :  { %v267_v49 = vmul.f32 %v263_v1, %v242_v38 }
 0x3d8   :  { %v317_v27 = vpop.permute.xlu0 %316 }
 0x3d9   :  { %v321_v29 = vadd.f32 %v317_v27, %v309_v26 }
 0x3db   :  { %v1419_v30 = vpack.i.bf16 %v321_v29, %v320_v28  ;;  %v366_v31 = vpack.c.bf16 %v321_v29, %v320_v28 }
 0x3dc   :  { %v235_v35 = vpop.permute.xlu0 %234 }
 0x3dd   :  { %1420 = vrot.lane.b32.xlu0 %v1419_v30, %s1567_s18  ;;  %1415 = vrot.lane.b32.xlu1 %v1419_v30, %s1568_s19  ;;  %v241_v43 = vsel %vm240_vm4, %v229_v3, %v235_v35 }
 0x3de   :  { %v266_v50 = vmul.f32 %v261_v0, %v241_v43  ;;  %v269_v0 = vadd.f32 %v267_v49, %v259_v54 }
 0x3e0   :  { %v250_v37 = vpop.permute.xlu0 %249  ;;  %v268_v1 = vadd.f32 %v266_v50, %v258_v55 }
 0x3e1   :  { %251 = vrot.lane.b32.xlu1 %v1719_v60, %s1566_s17  ;;  %393 = vrot.lane.b32.xlu0 %v366_v31, %s1559_s11  ;;  %v256_v46 = vsel %vm255_vm5, %v244_v2, %v250_v37 }
 0x3e2   :  { %v276_v56 = vmul.f32 %v271_v9, %v256_v46 }
 0x3e4   :  { %v278_v39 = vadd.f32 %v276_v56, %v268_v1 }
 0x3e5   :  { %1425 = vrot.lane.b32.xlu1 %v1419_v30, %s1569_s20 }
 0x44f   :  { %v1416_v44 = vpop.permute.xlu1 %1415  ;;  %v1421_v45 = vpop.permute.xlu0 %1420 }
 0x450   :  { %v1418_v47 = vunpack.i.h.bf16 %v1416_v44  ;;  %v1417_v48 = vunpack.i.l.bf16 %v1416_v44  ;;  %v1423_v52 = vunpack.i.h.bf16 %v1421_v45  ;;  %v1422_v53 = vunpack.i.l.bf16 %v1421_v45 }
 0x452   :  { %v367_v51 = vpack.c.bf16 %v1418_v47, %v1417_v48  ;;  %v368_v4 = vpack.c.bf16 %v1423_v52, %v1422_v53 }
 0x453   :  { %v252_v57 = vpop.permute.xlu1 %251  ;;  %v394_v59 = vpop.permute.xlu0 %393 }
 0x454   :  { %v257_v61 = vsel %vm255_vm5, %v246_v15, %v252_v57  ;;  %v408_v2 = vsel %vm403_vm6, %v394_v59, 0  ;;  %452 = vrot.lane.b32.xlu1 %v367_v51, %s1559_s11 }
 0x455   :  { %v277_v3 = vmul.f32 %v273_v18, %v257_v61  ;;  %1285 = vmatpush3.bf16.xpose.msra.mxu1 %v408_v2 }
 0x456   :  { %1290 = vmatprep.subr.bf16.mxu1 %v1557_v41 }
 0x457   :  { %v279_v5 = vadd.f32 %v277_v3, %v269_v0  ;;  %v1426_v6 = vpop.permute.xlu1 %1425 }
 0x458   :  { %v1428_v32 = vunpack.i.h.bf16 %v1426_v6  ;;  %v1427_v7 = vunpack.i.l.bf16 %v1426_v6  ;;  %502 = vrot.lane.b32.xlu1 %v368_v4, %s1559_s11 }
 0x459   :  { %v1429_v8 = vpack.i.bf16 %v279_v5, %v278_v39  ;;  %v342_v9 = vpack.c.bf16 %v279_v5, %v278_v39 }
 0x45a   :  { %v369_v10 = vpack.c.bf16 %v1428_v32, %v1427_v7 }
 0x45b   :  { %1430 = vrot.lane.b32.xlu0 %v1429_v8, %s1568_s19 }
 0x45c   :  { %1287 = vmatmul.mubr.msk.bf16.vlgmr.msra.gmra.mrb[4].mxu1 %vm403_vm6, %v342_v9  ;;  %1435 = vrot.lane.b32.xlu1 %v1429_v8, %s1567_s18 }
 0x45d   :  { %1292 = vmatprep.mubr.msk.bf16.mxu1 %vm1558_vm3, %v1557_v41 }
 0x45f   :  { %552 = vrot.lane.b32.xlu0 %v369_v10, %s1559_s11 }
 0x460   :  { %397 = vrot.lane.b32.xlu1 %v1774_v11, %s1559_s11 }
 0x463   :  { %1440 = vrot.lane.b32.xlu0 %v1429_v8, %s1569_s20 }
 0x467   :  { %399 = vrot.lane.b32.xlu0 %v1785_v12, %s1559_s11 }
 0x4c6   :  { %v453_v13 = vpop.permute.xlu1 %452 }
 0x4c7   :  { %v458_v14 = vsel %vm403_vm6, %v453_v13, 0 }
 0x4c8   :  { %1291 = vmatpush3.bf16.xpose.msra.mxu1 %v458_v14 }
 0x4c9   :  { %1296 = vmatprep.subr.bf16.mxu1 %v1557_v41 }
 0x4ca   :  { %v503_v15 = vpop.permute.xlu1 %502 }
 0x4cb   :  { %v508_v22 = vsel %vm403_vm6, %v503_v15, 0 }
 0x4cd   :  { %v1431_v16 = vpop.permute.xlu0 %1430 }
 0x4ce   :  { %v1433_v17 = vunpack.i.h.bf16 %v1431_v16  ;;  %v1432_v18 = vunpack.i.l.bf16 %v1431_v16  ;;  %v1436_v20 = vpop.permute.xlu1 %1435 }
 0x4cf   :  { %v1438_v24 = vunpack.i.h.bf16 %v1436_v20  ;;  %v1437_v25 = vunpack.i.l.bf16 %v1436_v20 }
 0x4d0   :  { %v343_v19 = vpack.c.bf16 %v1433_v17, %v1432_v18 }
 0x4d1   :  { %v553_v21 = vpop.permute.xlu0 %552  ;;  %v344_v29 = vpack.c.bf16 %v1438_v24, %v1437_v25 }
 0x4d2   :  { %v558_v23 = vsel %vm403_vm6, %v553_v21, 0  ;;  %1293 = vmatmul.mubr.msk.bf16.vlgmr.msra.gmra.mrb[8].mxu1 %vm403_vm6, %v343_v19  ;;  %v398_v31 = vpop.permute.xlu1 %397 }
 0x4d3   :  { %1297 = vmatpush3.bf16.xpose.msra.mxu1 %v508_v22  ;;  %1303 = vmatpush3.bf16.xpose.msra.mxu0 %v558_v23 }
 0x4d4   :  { %1298 = vmatprep.mubr.msk.bf16.mxu1 %vm1558_vm3, %v1557_v41  ;;  %1308 = vmatprep.subr.bf16.mxu1 %v1557_v41 }
 0x4d5   :  { %v1441_v26 = vpop.permute.xlu0 %1440  ;;  %1314 = vmatprep.subr.bf16.mxu0 %v1557_v41 }
 0x4d6   :  { %v1443_v27 = vunpack.i.h.bf16 %v1441_v26  ;;  %v1442_v28 = vunpack.i.l.bf16 %v1441_v26 }
 0x4d8   :  { %v345_v30 = vpack.c.bf16 %v1443_v27, %v1442_v28 }
 0x4d9   :  { %v400_v36 = vpop.permute.xlu0 %399 }
 0x4da   :  { %1299 = vmatmul.mubr.msk.bf16.vlgmr.msra.gmra.mrb[12].mxu1 %vm403_vm6, %v344_v29  ;;  %1305 = vmatmul.mubr.msk.bf16.vlgmr.msra.gmra.mrb[4].mxu0 %vm403_vm6, %v345_v30 }
 0x4db   :  { %1310 = vmatprep.mubr.msk.bf16.mxu1 %vm1558_vm3, %v1557_v41  ;;  %1316 = vmatprep.mubr.msk.bf16.mxu0 %vm1558_vm3, %v1557_v41 }
 0x52f   :  { %v444_v35 = vpop.f32.mrb[4].mxu1 }
 0x530   :  { %v1288_v37 = vpop.f32.mrb[5].mxu1  ;;  %v445_v38 = vadd.f32 %v444_v35, %v398_v31 }
 0x531   :  { %v447_v43 = vpop.f32.mrb[6].mxu1 }
 0x532   :  { %v1289_v44 = vpop.f32.mrb[7].mxu1  ;;  %v602_v45 = vsel %vm601_vm7, %v445_v38, -inf  ;;  %v448_v46 = vadd.f32 %v447_v43, %v400_v36 }
 0x533   :  { %603 = vmax.xlane.f32.xlu1 %v602_v45 }
 0x534   :  { %v605_v47 = vsel %vm601_vm7, %v448_v46, -inf }
 0x535   :  { %606 = vmax.xlane.f32.xlu0 %v605_v47 }
 0x5a5   :  { %v494_v48 = vpop.f32.mrb[8].mxu1 }
 0x5a6   :  { %v495_v49 = vadd.f32 %v494_v48, %v398_v31  ;;  %v1294_v50 = vpop.f32.mrb[9].mxu1 }
 0x5a7   :  { %v497_v51 = vpop.f32.mrb[10].mxu1 }
 0x5a8   :  { %v498_v52 = vadd.f32 %v497_v51, %v400_v36  ;;  %v1295_v53 = vpop.f32.mrb[11].mxu1  ;;  %v608_v54 = vsel %vm601_vm7, %v495_v49, -inf }
 0x5a9   :  { %609 = vmax.xlane.f32.xlu0 %v608_v54 }
 0x5aa   :  { %v611_v55 = vsel %vm601_vm7, %v498_v52, -inf }
 0x5ab   :  { %612 = vmax.xlane.f32.xlu1 %v611_v55 }
 0x5ad   :  { %v544_v56 = vpop.f32.mrb[12].mxu1  ;;  %v594_v57 = vpop.f32.mrb[4].mxu0 }
 0x5ae   :  { %v545_v59 = vadd.f32 %v544_v56, %v398_v31  ;;  %v1300_v61 = vpop.f32.mrb[13].mxu1  ;;  %v1306_v2 = vpop.f32.mrb[5].mxu0  ;;  %v595_v3 = vadd.f32 %v594_v57, %v398_v31 }
 0x5af   :  { %v547_v0 = vpop.f32.mrb[14].mxu1  ;;  %v597_v1 = vpop.f32.mrb[6].mxu0 }
 0x5b0   :  { %v548_v4 = vadd.f32 %v547_v0, %v400_v36  ;;  %v1301_v39 = vpop.f32.mrb[15].mxu1  ;;  %v1307_v5 = vpop.f32.mrb[7].mxu0  ;;  %v614_v6 = vsel %vm601_vm7, %v545_v59, -inf  ;;  %v598_v32 = vadd.f32 %v597_v1, %v400_v36  ;;  %v620_v8 = vsel %vm601_vm7, %v595_v3, -inf }
 0x5b1   :  { %615 = vmax.xlane.f32.xlu0 %v614_v6 }
 0x5b2   :  { %v617_v7 = vsel %vm601_vm7, %v548_v4, -inf  ;;  %v623_v9 = vsel %vm601_vm7, %v598_v32, -inf }
 0x5b3   :  { %618 = vmax.xlane.f32.xlu1 %v617_v7 }
 0x5b5   :  { %621 = vmax.xlane.f32.xlu0 %v620_v8 }
 0x5b7   :  { %624 = vmax.xlane.f32.xlu1 %v623_v9 }
 0x5c0   :  { %v604_v10 = vpop.xlane.xlu1 %603 }
 0x5c1   :  { %v626_v13 = vsub.f32 %v445_v38, %v604_v10 }
 0x5c2   :  { %v607_v15 = vpop.xlane.xlu0 %606 }
 0x5c3   :  { %v634_v14 = vmul.f32 1.442695, %v626_v13  ;;  %v627_v16 = vsub.f32 %v448_v46, %v607_v15 }
 0x5c5   :  { %1486 = vpow2.f32 %v634_v14  ;;  %v636_v17 = vmul.f32 1.442695, %v627_v16 }
 0x5c7   :  { %1488 = vpow2.f32 %v636_v17 }
 0x5c8   :  { %1450 = vrot.lane.b32.xlu1 %v1723_v62, %s1567_s18 }
 0x5cb   :  { %1445 = vrot.lane.b32.xlu0 %v1723_v62, %s1568_s19 }
 0x5cc   :  { %1455 = vrot.lane.b32.xlu1 %v1723_v62, %s1569_s20 }
 0x5cf   :  { %v1822_v18 = vpop.eup %1486 }
 0x5d0   :  { %695 = vrot.lane.b32.xlu1 %v388_v63, %s1564_s15  ;;  %v650_v19 = vsel %vm601_vm7, %v1822_v18, 0.0 }
 0x5d1   :  { %v1826_v62 = vpop.eup %1488 }
 0x5d2   :  { %v653_v58 = vsel %vm601_vm7, %v1826_v62, 0.0 }
 0x5ea   :  { %651 = vadd.xlane.f32.xlu0 %v650_v19 }
 0x5f4   :  { %654 = vadd.xlane.f32.xlu1 %v653_v58 }
 0x636   :  { %v610_v60 = vpop.xlane.xlu0 %609 }
 0x637   :  { %v628_v63 = vsub.f32 %v495_v49, %v610_v60 }
 0x638   :  { %v613_v20 = vpop.xlane.xlu1 %612 }
 0x639   :  { %v638_v21 = vmul.f32 1.442695, %v628_v63  ;;  %v629_v22 = vsub.f32 %v498_v52, %v613_v20 }
 0x63b   :  { %1490 = vpow2.f32 %v638_v21  ;;  %v640_v23 = vmul.f32 1.442695, %v629_v22 }
 0x63d   :  { %1492 = vpow2.f32 %v640_v23 }
 0x63e   :  { %v616_v24 = vpop.xlane.xlu0 %615 }
 0x63f   :  { %v630_v25 = vsub.f32 %v545_v59, %v616_v24 }
 0x640   :  { %v619_v26 = vpop.xlane.xlu1 %618 }
 0x641   :  { %v631_v28 = vsub.f32 %v548_v4, %v619_v26  ;;  %v642_v30 = vmul.f32 1.442695, %v630_v25 }
 0x642   :  { %v622_v27 = vpop.xlane.xlu0 %621 }
 0x643   :  { %v632_v29 = vsub.f32 %v595_v3, %v622_v27  ;;  %v644_v44 = vmul.f32 1.442695, %v631_v28 }
 0x644   :  { %v625_v31 = vpop.xlane.xlu1 %624 }
 0x645   :  { %v1830_v35 = vpop.eup %1490  ;;  %v646_v36 = vmul.f32 1.442695, %v632_v29  ;;  %v633_v37 = vsub.f32 %v598_v32, %v625_v31 }
 0x646   :  { %v656_v38 = vsel %vm601_vm7, %v1830_v35, 0.0  ;;  %v1446_v2 = vpop.permute.xlu0 %1445 }
 0x647   :  { %v1834_v43 = vpop.eup %1492  ;;  %1494 = vpow2.f32 %v646_v36  ;;  %v648_v45 = vmul.f32 1.442695, %v633_v37  ;;  %657 = vadd.xlane.f32.xlu0 %v656_v38  ;;  %v1448_v4 = vunpack.i.h.bf16 %v1446_v2  ;;  %v1447_v39 = vunpack.i.l.bf16 %v1446_v2 }
 0x648   :  { %1496 = vpow2.f32 %v642_v30  ;;  %v1451_v46 = vpop.permute.xlu1 %1450  ;;  %v659_v47 = vsel %vm601_vm7, %v1834_v43, 0.0 }
 0x649   :  { %1498 = vpow2.f32 %v648_v45  ;;  %v1453_v59 = vunpack.i.h.bf16 %v1451_v46  ;;  %v1452_v61 = vunpack.i.l.bf16 %v1451_v46  ;;  %v389_v6 = vpack.c.bf16 %v1448_v4, %v1447_v39 }
 0x64a   :  { %1500 = vpow2.f32 %v644_v44 }
 0x64b   :  { %660 = vadd.xlane.f32.xlu0 %v659_v47  ;;  %v390_v0 = vpack.c.bf16 %v1453_v59, %v1452_v61 }
 0x64c   :  { %v1456_v48 = vpop.permute.xlu1 %1455 }
 0x64d   :  { %v1458_v1 = vunpack.i.h.bf16 %v1456_v48  ;;  %v1457_v3 = vunpack.i.l.bf16 %v1456_v48 }
 0x64f   :  { %v391_v5 = vpack.c.bf16 %v1458_v1, %v1457_v3 }
 0x650   :  { %v696_v49 = vpop.permute.xlu1 %695 }
 0x651   :  { %v1838_v50 = vpop.eup %1494  ;;  %1309 = vmatpush3.bf16.msra.mxu1 %v696_v49 }
 0x652   :  { %v1840_v51 = vpop.eup %1496  ;;  %v668_v52 = vsel %vm601_vm7, %v1838_v50, 0.0  ;;  %1320 = vmatprep.subr.bf16.mxu1 %v1557_v41 }
 0x653   :  { %v1845_v53 = vpop.eup %1498  ;;  %669 = vadd.xlane.f32.xlu1 %v668_v52  ;;  %v662_v56 = vsel %vm601_vm7, %v1840_v51, 0.0 }
 0x654   :  { %v671_v54 = vsel %vm601_vm7, %v1845_v53, 0.0  ;;  %v1849_v55 = vpop.eup %1500 }
 0x655   :  { %672 = vadd.xlane.f32.xlu0 %v671_v54  ;;  %v665_v57 = vsel %vm601_vm7, %v1849_v55, 0.0 }
 0x657   :  { %663 = vadd.xlane.f32.xlu1 %v662_v56 }
 0x659   :  { %666 = vadd.xlane.f32.xlu0 %v665_v57 }
 0x668   :  { %791 = vrot.lane.b32.xlu1 %v390_v0, %s1564_s15 }
 0x66c   :  { %839 = vrot.lane.b32.xlu1 %v391_v5, %s1564_s15 }
 0x66f   :  { %743 = vrot.lane.b32.xlu0 %v389_v6, %s1564_s15 }
 0x673   :  { %918 = vrot.lane.b32.xlu0 %v1686_v40, %s1556_s1 }
 0x677   :  { %v652_v32 = vpop.xlane.xlu0 %651 }
 0x678   :  { %1502 = vrcp.f32 %v652_v32 }
 0x681   :  { %v655_v7 = vpop.xlane.xlu1 %654 }
 0x682   :  { %1504 = vrcp.f32 %v655_v7  ;;  %v1503_v8 = vpop.eup %1502 }
 0x683   :  { %v682_v10 = vmul.f32 %v1503_v8, %v1822_v18 }
 0x68c   :  { %v1505_v9 = vpop.eup %1504 }
 0x68d   :  { %v683_v13 = vmul.f32 %v1505_v9, %v1826_v62 }
 0x68f   :  { %v690_v14 = vpack.c.bf16 %v683_v13, %v682_v10 }
 0x691   :  { %1311 = vmatmul.mubr.msk.bf16.vlgmr.msra.gmra.mrb[16].mxu1 %vm601_vm7, %v690_v14 }
 0x692   :  { %1322 = vmatprep.mubr.msk.bf16.mxu1 %vm1558_vm3, %v1557_v41 }
 0x6d4   :  { %v658_v15 = vpop.xlane.xlu0 %657 }
 0x6d8   :  { %v661_v16 = vpop.xlane.xlu0 %660 }
 0x6d9   :  { %1506 = vrcp.f32 %v661_v16 }
 0x6da   :  { %1508 = vrcp.f32 %v658_v15 }
 0x6e0   :  { %v670_v40 = vpop.xlane.xlu1 %669 }
 0x6e2   :  { %v673_v17 = vpop.xlane.xlu0 %672 }
 0x6e3   :  { %1510 = vrcp.f32 %v673_v17  ;;  %v1507_v58 = vpop.eup %1506 }
 0x6e4   :  { %1512 = vrcp.f32 %v670_v40  ;;  %v664_v19 = vpop.xlane.xlu1 %663  ;;  %v1509_v60 = vpop.eup %1508  ;;  %v685_v62 = vmul.f32 %v1507_v58, %v1834_v43 }
 0x6e5   :  { %1514 = vrcp.f32 %v664_v19  ;;  %v684_v20 = vmul.f32 %v1509_v60, %v1830_v35 }
 0x6e6   :  { %v667_v18 = vpop.xlane.xlu0 %666 }
 0x6e7   :  { %1516 = vrcp.f32 %v667_v18  ;;  %v691_v22 = vpack.c.bf16 %v685_v62, %v684_v20 }
 0x6e8   :  { %v792_v63 = vpop.permute.xlu1 %791 }
 0x6e9   :  { %1321 = vmatpush3.bf16.msra.mxu1 %v792_v63 }
 0x6ea   :  { %v744_v21 = vpop.permute.xlu0 %743  ;;  %1332 = vmatprep.subr.bf16.mxu1 %v1557_v41 }
 0x6eb   :  { %1315 = vmatpush3.bf16.msra.mxu0 %v744_v21 }
 0x6ec   :  { %1326 = vmatprep.subr.bf16.mxu0 %v1557_v41  ;;  %v840_v25 = vpop.permute.xlu1 %839 }
 0x6ed   :  { %v1511_v23 = vpop.eup %1510 }
 0x6ee   :  { %v1513_v24 = vpop.eup %1512  ;;  %1317 = vmatmul.mubr.msk.bf16.vlgmr.msra.gmra.mrb[8].mxu0 %vm601_vm7, %v691_v22  ;;  %v689_v27 = vmul.f32 %v1511_v23, %v1845_v53  ;;  %v919_v45 = vpop.permute.xlu0 %918 }
 0x6ef   :  { %v1515_v26 = vpop.eup %1514  ;;  %1327 = vmatpush3.bf16.msra.mxu0 %v840_v25  ;;  %1328 = vmatprep.mubr.msk.bf16.mxu0 %vm1558_vm3, %v1557_v41  ;;  %v688_v29 = vmul.f32 %v1513_v24, %v1838_v50 }
 0x6f0   :  { %1340 = vmatprep.subr.bf16.mxu0 %v1557_v41  ;;  %v686_v30 = vmul.f32 %v1515_v26, %v1840_v51 }
 0x6f1   :  { %v1517_v28 = vpop.eup %1516  ;;  %v693_v36 = vpack.c.bf16 %v689_v27, %v688_v29 }
 0x6f2   :  { %v687_v31 = vmul.f32 %v1517_v28, %v1849_v55 }
 0x6f4   :  { %v692_v35 = vpack.c.bf16 %v687_v31, %v686_v30 }
 0x6f6   :  { %1323 = vmatmul.mubr.msk.bf16.vlgmr.msra.gmra.mrb[20].mxu1 %vm601_vm7, %v692_v35  ;;  %1329 = vmatmul.mubr.msk.bf16.vlgmr.msra.gmra.mrb[12].mxu0 %vm601_vm7, %v693_v36 }
 0x6f7   :  { %1336 = vmatprep.mubr.msk.bf16.mxu1 %vm1558_vm3, %v1557_v41  ;;  %1344 = vmatprep.mubr.msk.bf16.mxu0 %vm1558_vm3, %v1557_v41 }
 0x6f8   :  { %1333 = vmatpush3.bf16.msra.mxu1 %v919_v45 }
 0x6f9   :  { %1334 = vmatprep.subr.bf16.mxu1 %v1557_v41 }
 0x764   :  { %v735_v37 = vpop.f32.mrb[16].mxu1 }
 0x765   :  { %v1312_v38 = vpop.f32.mrb[17].mxu1 }
 0x766   :  { %v738_v43 = vpop.f32.mrb[18].mxu1  ;;  %v1478_v38 = vld [vmem:[%s1957_s4] sm:$0xff]  }
 0x767   :  { %v1313_v44 = vpop.f32.mrb[19].mxu1 }
 0x7c1   :  { %v783_v46 = vpop.f32.mrb[8].mxu0 }
 0x7c2   :  { %v1318_v47 = vpop.f32.mrb[9].mxu0 }
 0x7c3   :  { %v786_v48 = vpop.f32.mrb[10].mxu0 }
 0x7c4   :  { %v1459_v49 = vpack.i.bf16 %v786_v48, %v783_v46  ;;  %v1319_v50 = vpop.f32.mrb[11].mxu0 }
 0x7c6   :  { %1460 = vrot.lane.b32.xlu1 %v1459_v49, %s1570_s2 }
 0x7c9   :  { %v831_v51 = vpop.f32.mrb[20].mxu1  ;;  %v879_v52 = vpop.f32.mrb[12].mxu0 }
 0x7ca   :  { %v1324_v53 = vpop.f32.mrb[21].mxu1  ;;  %v1330_v54 = vpop.f32.mrb[13].mxu0 }
 0x7cb   :  { %v834_v55 = vpop.f32.mrb[22].mxu1  ;;  %v882_v56 = vpop.f32.mrb[14].mxu0 }
 0x7cc   :  { %v1464_v57 = vpack.i.bf16 %v834_v55, %v831_v51  ;;  %v1469_v59 = vpack.i.bf16 %v882_v56, %v879_v52  ;;  %v1325_v61 = vpop.f32.mrb[23].mxu1  ;;  %v1331_v2 = vpop.f32.mrb[15].mxu0 }
 0x7ce   :  { %1470 = vrot.lane.b32.xlu1 %v1469_v59, %s1571_s25  ;;  %1465 = vrot.lane.b32.xlu0 %v1464_v57, %s1572_s26 }
 0x7d2   :  { %920 = vrot.lane.b32.xlu0 %v1695_v42, %s1556_s1 }
 0x838   :  { %v1461_v0 = vpop.permute.xlu1 %1460 }
 0x839   :  { %v1463_v1 = vunpack.i.h.bf16 %v1461_v0  ;;  %v1462_v3 = vunpack.i.l.bf16 %v1461_v0 }
 0x83b   :  { %v910_v8 = vsel %vm403_vm6, %v735_v37, %v1462_v3  ;;  %v911_v9 = vsel %vm403_vm6, %v738_v43, %v1463_v1  ;;  %v1479_v43 = vld [vmem:[%s1957_s4 + $0x8] sm:$0xff]  }
 0x840   :  { %v1471_v4 = vpop.permute.xlu1 %1470  ;;  %v1466_v39 = vpop.permute.xlu0 %1465 }
 0x841   :  { %v1473_v5 = vunpack.i.h.bf16 %v1471_v4  ;;  %v1472_v6 = vunpack.i.l.bf16 %v1471_v4  ;;  %v1468_v32 = vunpack.i.h.bf16 %v1466_v39  ;;  %v1467_v7 = vunpack.i.l.bf16 %v1466_v39 }
 0x843   :  { %v913_v10 = vsel %vm601_vm7, %v911_v9, %v1468_v32  ;;  %v912_v13 = vsel %vm601_vm7, %v910_v8, %v1467_v7 }
 0x844   :  { %v916_v14 = vsel %vm914_vm8, %v913_v10, %v1473_v5  ;;  %v915_v42 = vsel %vm914_vm8, %v912_v13, %v1472_v6  ;;  %v921_v15 = vpop.permute.xlu0 %920 }
 0x845   :  { %v917_v16 = vpack.c.bf16 %v916_v14, %v915_v42  ;;  %1335 = vmatpush3.bf16.msra.mxu1 %v921_v15 }
 0x846   :  { %1348 = vmatprep.subr.bf16.mxu1 %v1557_v41 }
 0x848   :  { %1337 = vmatmul.mubr.msk.bf16.vlgmr.msra.gmra.mrb[24].mxu1 %vm143_vm2, %v917_v16 }
 0x849   :  { %1356 = vmatprep.mubr.msk.bf16.mxu1 %vm1558_vm3, %v1557_v41  ;;  %1349 = vmatpush3.bf16.msra.mxu1 %v1478_v38 }
 0x84a   :  { %1350 = vmatprep.subr.bf16.mxu1 %v1557_v41 }
 0x84d   :  { %1351 = vmatpush3.bf16.msra.mxu1 %v1479_v43 }
 0x84e   :  { %1352 = vmatprep.subr.bf16.mxu1 %v1557_v41 }
 0x91b   :  { %v961_v40 = vpop.f32.mrb[24].mxu1 }
 0x91c   :  { %v1896_v17 = vadd.f32 %v961_v40, %v1668_v34  ;;  %v1338_v19 = vpop.f32.mrb[25].mxu1  ;;  %v1476_v34 = vld [vmem:[%s1956_s3 + $0x4] ss:$8 sps:$4 sm:$0xff]  }
 0x91d   :  { %v964_v58 = vpop.f32.mrb[26].mxu1  ;;  %1341 = vmatpush3.bf16.msra.mxu0 %v1476_v34 }
 0x91e   :  { %v1899_v18 = vadd.f32 %v1666_v33, %v964_v58  ;;  %v1339_v60 = vpop.f32.mrb[27].mxu1  ;;  %v970_v62 = vmul.f32 %v1896_v17, %v1896_v17  ;;  %v1477_v33 = vld [vmem:[%s1956_s3 + $0x14] ss:$8 sps:$4 sm:$0xff]   ;;  %1342 = vmatprep.subr.bf16.mxu0 %v1557_v41 }
 0x920   :  { %v972_v63 = vsel %vm143_vm2, %v970_v62, 0.0  ;;  %v971_v20 = vmul.f32 %v1899_v18, %v1899_v18 }
 0x921   :  { %973 = vadd.xlane.f32.xlu1 %v972_v63  ;;  %1343 = vmatpush3.bf16.msra.mxu0 %v1477_v33 }
 0x922   :  { %v975_v21 = vsel %vm143_vm2, %v971_v20, 0.0 }
 0x923   :  { %976 = vadd.xlane.f32.xlu0 %v975_v21 }
 0x9ae   :  { %v974_v22 = vpop.xlane.xlu1 %973 }
 0x9af   :  { %v978_v23 = vmul.f32 0.03125, %v974_v22 }
 0x9b0   :  { %v977_v24 = vpop.xlane.xlu0 %976 }
 0x9b1   :  { %v980_v25 = vadd.f32 1e-06, %v978_v23  ;;  %v979_v26 = vmul.f32 0.03125, %v977_v24 }
 0x9b3   :  { %1518 = vrsqrt.f32 %v980_v25  ;;  %v981_v27 = vadd.f32 1e-06, %v979_v26 }
 0x9b5   :  { %1520 = vrsqrt.f32 %v981_v27 }
 0x9bd   :  { %v1519_v28 = vpop.eup %1518 }
 0x9be   :  { %v984_v29 = vmul.f32 %v1519_v28, %v1896_v17 }
 0x9bf   :  { %v1521_v30 = vpop.eup %1520 }
 0x9c0   :  { %v985_v31 = vmul.f32 %v1521_v30, %v1899_v18  ;;  %v986_v35 = vmul.f32 %v984_v29, %v1774_v11  ;;  %v1480_v11 = vld [vmem:[%s1957_s4 + $0x10] sm:$0xff]  }
 0x9c1   :  { %1353 = vmatpush3.bf16.msra.mxu1 %v1480_v11 }
 0x9c2   :  { %v987_v36 = vmul.f32 %v985_v31, %v1785_v12  ;;  %1354 = vmatprep.subr.bf16.mxu1 %v1557_v41  ;;  %v1481_v12 = vld [vmem:[%s1957_s4 + $0x18] sm:$0xff]   ;;  %s1573_s4 = smov [#allocation2]  }
 0x9c3   :  { %s1156_s12 = sshll.u32 %s1573_s4, 4  ;;  %s1157_s12 = int_to_ptr.vmem [resolvable:$true] %s1156_s12 }
 0x9c4   :  { %v988_v37 = vpack.c.bf16 %v987_v36, %v986_v35  ;;  %s1530_s0 = scalar_lea.vmem %s1157_s12, 256  ;;  %p1535_p1 = scmp.lt.s32.totalorder %s1157_s12, %s1157_s12 }
 0x9c5   :  { %1355 = vmatpush3.bf16.msra.mxu1 %v1481_v12  ;;  %p1531_p0 = scmp.ne.s32.totalorder %s1157_s12, %s1530_s0  ;;  %p1536_p2 = scmp.lt.s32.totalorder %s1530_s0, %s1530_s0 }
 0x9c6   :  { %1345 = vmatmul.mubr.msk.bf16.vlgmr.msra.gmra.mrb[16].mxu0 %vm143_vm2, %v988_v37 }
 0x9c7   :  { %p1537_p3 = por %p1536_p2, %p1535_p1 }
 0x9c9   :  { %p1538_p4 = pnand %p1537_p3, %p1531_p0 }
 0xa99   :  { %v1038_v44 = vpop.f32.mrb[16].mxu0 }
 0xa9a   :  { %1061 = vrot.lane.b32.xlu0 %v1038_v44, %s1564_s15  ;;  %v1346_v45 = vpop.f32.mrb[17].mxu0  ;;  %v1186_v48 = vmul.f32 -1.442695, %v1038_v44 }
 0xa9b   :  { %v1041_v46 = vpop.f32.mrb[18].mxu0 }
 0xa9c   :  { %1063 = vrot.lane.b32.xlu1 %v1041_v46, %s1564_s15  ;;  %v1347_v47 = vpop.f32.mrb[19].mxu0  ;;  %v1187_v49 = vmul.f32 -1.442695, %v1041_v46  ;;  %1522 = vpow2.f32 %v1186_v48 }
 0xa9e   :  { %1524 = vpow2.f32 %v1187_v49 }
 0xaa6   :  { %v1523_v50 = vpop.eup %1522 }
 0xaa7   :  { %v1051_v41 = vadd.f32 1.0, %v1523_v50 }
 0xaa8   :  { %v1525_v51 = vpop.eup %1524 }
 0xaa9   :  { %v1052_v52 = vadd.f32 1.0, %v1525_v51  ;;  %1526 = vrcp.f32 %v1051_v41 }
 0xaab   :  { %1528 = vrcp.f32 %v1052_v52 }
 0xab3   :  { %v1527_v53 = vpop.eup %1526 }
 0xab4   :  { %v1057_v56 = vmul.f32 %v1527_v53, %v1038_v44 }
 0xab5   :  { %v1529_v54 = vpop.eup %1528 }
 0xab6   :  { %v1058_v57 = vmul.f32 %v1529_v54, %v1041_v46 }
 0xb0c   :  { %v1062_v55 = vpop.permute.xlu0 %1061 }
 0xb0d   :  { %v1067_v61 = vmul.f32 %v1062_v55, %v1057_v56 }
 0xb0e   :  { %v1064_v59 = vpop.permute.xlu1 %1063 }
 0xb0f   :  { %v1068_v2 = vmul.f32 %v1064_v59, %v1058_v57 }
 0xb11   :  { %v1069_v0 = vpack.c.bf16 %v1068_v2, %v1067_v61 }
 0xb13   :  { %1357 = vmatmul.mubr.msk.bf16.vlgmr.msra.gmra.mrb[28].mxu1 %vm1102_vm9, %v1069_v0 }
 0xbe6   :  { %v1140_v1 = vpop.f32.mrb[28].mxu1 }
 0xbe7   :  { %v1147_v3 = vadd.f32 %v1140_v1, %v1896_v17  ;;  %v1358_v4 = vpop.f32.mrb[29].mxu1 }
 0xbe8   :  { %v1143_v39 = vpop.f32.mrb[30].mxu1 }
 0xbe9   :  { %1149 = vst.msk [vmem:[#allocation2] sm:$0xff] %vm143_vm2, %v1147_v3  ;;  %v1148_v5 = vadd.f32 %v1143_v39, %v1899_v18  ;;  %v1359_v6 = vpop.f32.mrb[31].mxu1 }
 0xbeb   :  { %1150 = vst.msk [vmem:[#allocation2 + $0x8] sm:$0xff] %vm143_vm2, %v1148_v5 }
 0xbec   :  { %1541 = shalt.err (!%p1538_p4)
}
 0xbed   :  { %s1542_s15 = scalar_lea.hbm %s1958_s5, 256 }
 0xbee   :  { %p1543_p5 = scmp.ne.s32.totalorder %s1958_s5, %s1542_s15  ;;  %p1546_p6 = scmp.lt.u32.totalorder %s1542_s15, %s1958_s5 }
 0xbf0   :  { %p1548_p7 = pnand %p1546_p6, %p1543_p5 }
 0xbf2   :  { %1551 = shalt.err (!%p1548_p7)
}
 0xbf3   :  { %s1574_s20 = smov 128  }
 0xbf4   :  { %1162 = dma.vmem_to_hbm [thread:$0]  %s1157_s12, 256, %s1958_s5, [#allocation3], %s1574_s20, %s1574_s20, %s1570_s2  }
 0xbf5   :  { %1552 = dma.done.wait [#allocation3], 256  }
 0xbf6   :  { %1553 = vsyncadd [#allocation3], 4294967040 }
 0xbf7   :  { %1166 = vsyncpa [#allocation3], 1 }

</bundles_post_ra>
